<compile_context>
chip_gen: v7x
topology: tpu7x:2x2x1
jax: 0.10.0
libtpu: 0.0.40
codegen_flags: <defaults>
</compile_context>

<pallas_src>
import functools
import math

import jax
import jax.numpy as jnp
from jax import lax
from jax.experimental import pallas as pl
from jax.experimental.pallas import tpu as pltpu


# --------------------------------------------------------------------------- VMEM-resident gather
def _gather_vmem_kernel(ids_ref, table_ref, pe_ref, out_ref, *, tile_rows, seq, vocab, scale):
    # ids_ref:   (seq,)            int32 in SMEM (scalar prefetch)
    # table_ref: (vocab, d_model)  f32, VMEM-resident (constant index_map, single-buffered)
    # pe_ref:    (tile_rows, d_model) f32 block for this grid step
    # out_ref:   (tile_rows, d_model) int32 block for this grid step
    base = pl.program_id(0) * tile_rows

    def body(r, carry):
        # Clamp the SMEM index for the (possibly padded) last block, and clamp the token id
        # (matches jnp.take's clamping) so an invalid id never reads stale / OOB VMEM.
        srow = jnp.minimum(base + r, seq - 1)
        tok = jnp.clip(ids_ref[srow], 0, vocab - 1)
        row = table_ref[pl.ds(tok, 1), :]                        # (1, d_model) dynamic row read
        y = row * scale + pe_ref[pl.ds(r, 1), :]
        out_ref[pl.ds(r, 1), :] = y.astype(out_ref.dtype)        # trunc toward zero, like .long()
        return carry

    lax.fori_loop(0, tile_rows, body, 0, unroll=bool(tile_rows <= 16))


# --------------------------------------------------------------- HBM row-gather (large-vocab) path
def _gather_hbm_kernel(ids_ref, row_ref, pe_ref, out_ref, *, scale):
    # row_ref: (1, d_model) table row DMA'd straight from HBM via the data-dependent index_map.
    out_ref[...] = (row_ref[...] * scale + pe_ref[...]).astype(out_ref.dtype)


def _vmem_capacity_bytes():
    """Generation-aware VMEM capacity (per TensorCore); conservative v7x default if unavailable."""
    default = 64 * 1024 * 1024
    try:
        get_info = getattr(pltpu, "get_tpu_info", None)
        if get_info is None:
            return default
        cap = getattr(get_info(), "vmem_capacity_bytes", None)
        return int(cap) if cap else default
    except Exception:
        return default


def _pick_tile_rows(seq, d_model, tile_budget_bytes):
    """Largest row tile (multiple of 8, <=1024) whose double-buffered pe+out blocks fit the budget,
    capped so the grid has >= 2 steps when seq allows (keeps both v7x TensorCores busy)."""
    if seq <= 8:
        return seq
    per_row = 2 * 2 * 4 * d_model                  # pe + out blocks, double-buffered, 4B elements
    tile = 1024
    while tile > 8 and tile * per_row > tile_budget_bytes:
        tile //= 2
    half = ((seq + 1) // 2 + 7) // 8 * 8           # ~seq/2 rounded up to a multiple of 8
    return max(8, min(tile, half))


def general_embedding_pallas(x, table, pe):
    """x: (seq,) int token ids; table: (vocab, d_model) f32; pe: (>=seq, d_model) f32.
    Returns (1, seq, d_model) int32 (PyTorch returns int64 with identical values)."""
    seq = x.shape[0]
    vocab, d_model = table.shape
    scale = float(math.sqrt(d_model))

    ids = x.astype(jnp.int32)
    table = table.astype(jnp.float32)
    pe_seq = pe[:seq].astype(jnp.float32)

    cap = _vmem_capacity_bytes()
    vmem_limit = max(32 * 1024 * 1024, min(int(cap * 0.75), 100 * 1024 * 1024))
    slack = 2 * 1024 * 1024                         # compiler scratch headroom
    table_bytes = vocab * d_model * 4               # single-buffered (pl.Buffered(1))
    min_tile_bytes = 8 * 2 * 2 * 4 * d_model        # smallest (8-row) pe+out working set
    use_vmem_table = table_bytes + min_tile_bytes + slack <= vmem_limit

    compiler_params = pltpu.CompilerParams(
        dimension_semantics=("parallel",),          # row tiles are independent -> megacore split
        vmem_limit_bytes=vmem_limit,
    )

    if use_vmem_table:
        tile_rows = _pick_tile_rows(seq, d_model, vmem_limit - table_bytes - slack)
        grid = (pl.cdiv(seq, tile_rows),)
        out = pl.pallas_call(
            functools.partial(_gather_vmem_kernel, tile_rows=tile_rows, seq=seq,
                              vocab=vocab, scale=scale),
            out_shape=jax.ShapeDtypeStruct((seq, d_model), jnp.int32),
            grid_spec=pltpu.PrefetchScalarGridSpec(
                num_scalar_prefetch=1,              # token ids land in SMEM
                grid=grid,
                in_specs=[
                    # Constant index_map: DMA'd once, stays VMEM-resident, single-buffered.
                    pl.BlockSpec((vocab, d_model), lambda i, ids_ref: (0, 0),
                                 pipeline_mode=pl.Buffered(1)),
                    pl.BlockSpec((tile_rows, d_model), lambda i, ids_ref: (i, 0)),
                ],
                out_specs=pl.BlockSpec((tile_rows, d_model), lambda i, ids_ref: (i, 0)),
            ),
            compiler_params=compiler_params,
        )(ids, table, pe_seq)
    else:
        # Large-vocab fallback: table stays in HBM; a data-dependent pl.Element index_map streams
        # only the touched rows (auto double-buffered by the BlockSpec pipeline).
        out = pl.pallas_call(
            functools.partial(_gather_hbm_kernel, scale=scale),
            out_shape=jax.ShapeDtypeStruct((seq, d_model), jnp.int32),
            grid_spec=pltpu.PrefetchScalarGridSpec(
                num_scalar_prefetch=1,
                grid=(seq,),
                in_specs=[
                    pl.BlockSpec((pl.Element(1), d_model),
                                 lambda i, ids_ref: (ids_ref[i], 0)),
                    pl.BlockSpec((1, d_model), lambda i, ids_ref: (i, 0)),
                ],
                out_specs=pl.BlockSpec((1, d_model), lambda i, ids_ref: (i, 0)),
            ),
            compiler_params=compiler_params,
        )(ids, table, pe_seq)

    # unsqueeze(0).  d_model < 128 (the toy case) leaves store lanes idle; production d_model that
    # is a multiple of 128 is lane-dense automatically.
    # TODO(synk): torch returns int64; emitting int64 needs jax_enable_x64 — int32 holds the values.
    return out[None]


def make_positional_encoding(seq, d_model, dtype=jnp.float32):
    # Matches PositionEmbedding: base 1000 (not 10000), sin on even columns, cos on odd columns.
    position = jnp.arange(seq, dtype=jnp.float32)[:, None]                 # (seq, 1)
    exponent = jnp.arange(0, d_model, 2, dtype=jnp.float32) / d_model      # (d_model//2,)
    div_term = 1000.0 ** exponent
    angles = position / div_term                                           # (seq, d_model//2)
    pe = jnp.zeros((seq, d_model), dtype)
    pe = pe.at[:, 0::2].set(jnp.sin(angles).astype(dtype))
    pe = pe.at[:, 1::2].set(jnp.cos(angles).astype(dtype))
    return pe


def general_embedding_ref(x, table, pe):
    d_model = table.shape[1]
    emb = jnp.take(table, x.astype(jnp.int32), axis=0) * math.sqrt(d_model)
    y = emb + pe[: x.shape[0]]
    return y.astype(jnp.int32)[None]


if __name__ == "__main__":
    seq, d_model = 8, 32
    key = jax.random.PRNGKey(0)
    k_idx, k_tab = jax.random.split(key)

    # GeneralEmbedding builds nn.Embedding(x.size(0), d_model) from its own input, so the
    # vocabulary size equals the sequence length and ids must lie in [0, seq).
    x = jax.random.randint(k_idx, (seq,), 0, seq, dtype=jnp.int32)
    table = jax.random.normal(k_tab, (seq, d_model), dtype=jnp.float32)   # nn.Embedding init N(0,1)
    pe = make_positional_encoding(seq, d_model)

    y = general_embedding_pallas(x, table, pe)
    jax.block_until_ready(y)

    y_ref = general_embedding_ref(x, table, pe)
    assert y.shape == (1, seq, d_model) and y.dtype == jnp.int32
    assert jnp.array_equal(y, y_ref), "mismatch vs reference"
    print("KERNEL_OK")
</pallas_src>

<mosaic_0001>
module attributes {stable_mosaic.version = 11 : i64} {
  func.func @_gather_vmem_kernel(%arg0: i32, %arg1: memref<8xi32, #tpu.memory_space<smem>>, %arg2: memref<8x32xf32, #tpu.memory_space<vmem>>, %arg3: memref<8x32xf32, #tpu.memory_space<vmem>>, %arg4: memref<8x32xi32, #tpu.memory_space<vmem>>) attributes {dimension_semantics = [#tpu.dimension_semantics<parallel>], iteration_bounds = array<i64: 1>, scalar_prefetch = 1 : i64, scratch_operands = 0 : i64, tpu.core_type = #tpu.core_type<tc>, window_params = [{pipeline_mode = #tpu.pipeline_mode<synchronous>, transform_indices = @transform_0, window_bounds = array<i64: 8, 32>}, {transform_indices = @transform_1, window_bounds = array<i64: 8, 32>}, {transform_indices = @transform_2, window_bounds = array<i64: 8, 32>}]} {
    %c8_i32 = arith.constant 8 : i32
    %0 = arith.muli %arg0, %c8_i32 : i32
    %c0_i32 = arith.constant 0 : i32
    %1 = arith.addi %0, %c0_i32 : i32
    %c7_i32 = arith.constant 7 : i32
    %2 = arith.minsi %1, %c7_i32 : i32
    %3 = arith.index_cast %2 : i32 to index
    %4 = memref.load %arg1[%3] : memref<8xi32, #tpu.memory_space<smem>>
    %c0_i32_0 = arith.constant 0 : i32
    %c7_i32_1 = arith.constant 7 : i32
    %5 = arith.maxsi %c0_i32_0, %4 : i32
    %6 = arith.minsi %c7_i32_1, %5 : i32
    %7 = arith.index_cast %6 : i32 to index
    %c0 = arith.constant 0 : index
    %8 = vector.load %arg2[%7, %c0] : memref<8x32xf32, #tpu.memory_space<vmem>>, vector<1x32xf32>
    %cst = arith.constant 5.65685415 : f32
    %9 = vector.broadcast %cst : f32 to vector<1x32xf32>
    %10 = arith.mulf %8, %9 : vector<1x32xf32>
    %11 = arith.index_cast %c0_i32 : i32 to index
    %c0_2 = arith.constant 0 : index
    %12 = vector.load %arg3[%11, %c0_2] : memref<8x32xf32, #tpu.memory_space<vmem>>, vector<1x32xf32>
    %13 = arith.addf %10, %12 : vector<1x32xf32>
    %14 = arith.fptosi %13 : vector<1x32xf32> to vector<1x32xi32>
    %15 = arith.index_cast %c0_i32 : i32 to index
    %c0_3 = arith.constant 0 : index
    %16 = vector.load %arg4[%15, %c0_3] : memref<8x32xi32, #tpu.memory_space<vmem>>, vector<1x32xi32>
    tpu.vector_store %arg4[%15, %c0_3], %14 {strides = array<i32>} : memref<8x32xi32, #tpu.memory_space<vmem>>, vector<1x32xi32>,
    %c1_i32 = arith.constant 1 : i32
    %17 = arith.addi %0, %c1_i32 : i32
    %c7_i32_4 = arith.constant 7 : i32
    %18 = arith.minsi %17, %c7_i32_4 : i32
    %19 = arith.index_cast %18 : i32 to index
    %20 = memref.load %arg1[%19] : memref<8xi32, #tpu.memory_space<smem>>
    %c0_i32_5 = arith.constant 0 : i32
    %c7_i32_6 = arith.constant 7 : i32
    %21 = arith.maxsi %c0_i32_5, %20 : i32
    %22 = arith.minsi %c7_i32_6, %21 : i32
    %23 = arith.index_cast %22 : i32 to index
    %c0_7 = arith.constant 0 : index
    %24 = vector.load %arg2[%23, %c0_7] : memref<8x32xf32, #tpu.memory_space<vmem>>, vector<1x32xf32>
    %cst_8 = arith.constant 5.65685415 : f32
    %25 = vector.broadcast %cst_8 : f32 to vector<1x32xf32>
    %26 = arith.mulf %24, %25 : vector<1x32xf32>
    %27 = arith.index_cast %c1_i32 : i32 to index
    %c0_9 = arith.constant 0 : index
    %28 = vector.load %arg3[%27, %c0_9] : memref<8x32xf32, #tpu.memory_space<vmem>>, vector<1x32xf32>
    %29 = arith.addf %26, %28 : vector<1x32xf32>
    %30 = arith.fptosi %29 : vector<1x32xf32> to vector<1x32xi32>
    %31 = arith.index_cast %c1_i32 : i32 to index
    %c0_10 = arith.constant 0 : index
    %32 = vector.load %arg4[%31, %c0_10] : memref<8x32xi32, #tpu.memory_space<vmem>>, vector<1x32xi32>
    tpu.vector_store %arg4[%31, %c0_10], %30 {strides = array<i32>} : memref<8x32xi32, #tpu.memory_space<vmem>>, vector<1x32xi32>,
    %c2_i32 = arith.constant 2 : i32
    %33 = arith.addi %0, %c2_i32 : i32
    %c7_i32_11 = arith.constant 7 : i32
    %34 = arith.minsi %33, %c7_i32_11 : i32
    %35 = arith.index_cast %34 : i32 to index
    %36 = memref.load %arg1[%35] : memref<8xi32, #tpu.memory_space<smem>>
    %c0_i32_12 = arith.constant 0 : i32
    %c7_i32_13 = arith.constant 7 : i32
    %37 = arith.maxsi %c0_i32_12, %36 : i32
    %38 = arith.minsi %c7_i32_13, %37 : i32
    %39 = arith.index_cast %38 : i32 to index
    %c0_14 = arith.constant 0 : index
    %40 = vector.load %arg2[%39, %c0_14] : memref<8x32xf32, #tpu.memory_space<vmem>>, vector<1x32xf32>
    %cst_15 = arith.constant 5.65685415 : f32
    %41 = vector.broadcast %cst_15 : f32 to vector<1x32xf32>
    %42 = arith.mulf %40, %41 : vector<1x32xf32>
    %43 = arith.index_cast %c2_i32 : i32 to index
    %c0_16 = arith.constant 0 : index
    %44 = vector.load %arg3[%43, %c0_16] : memref<8x32xf32, #tpu.memory_space<vmem>>, vector<1x32xf32>
    %45 = arith.addf %42, %44 : vector<1x32xf32>
    %46 = arith.fptosi %45 : vector<1x32xf32> to vector<1x32xi32>
    %47 = arith.index_cast %c2_i32 : i32 to index
    %c0_17 = arith.constant 0 : index
    %48 = vector.load %arg4[%47, %c0_17] : memref<8x32xi32, #tpu.memory_space<vmem>>, vector<1x32xi32>
    tpu.vector_store %arg4[%47, %c0_17], %46 {strides = array<i32>} : memref<8x32xi32, #tpu.memory_space<vmem>>, vector<1x32xi32>,
    %c3_i32 = arith.constant 3 : i32
    %49 = arith.addi %0, %c3_i32 : i32
    %c7_i32_18 = arith.constant 7 : i32
    %50 = arith.minsi %49, %c7_i32_18 : i32
    %51 = arith.index_cast %50 : i32 to index
    %52 = memref.load %arg1[%51] : memref<8xi32, #tpu.memory_space<smem>>
    %c0_i32_19 = arith.constant 0 : i32
    %c7_i32_20 = arith.constant 7 : i32
    %53 = arith.maxsi %c0_i32_19, %52 : i32
    %54 = arith.minsi %c7_i32_20, %53 : i32
    %55 = arith.index_cast %54 : i32 to index
    %c0_21 = arith.constant 0 : index
    %56 = vector.load %arg2[%55, %c0_21] : memref<8x32xf32, #tpu.memory_space<vmem>>, vector<1x32xf32>
    %cst_22 = arith.constant 5.65685415 : f32
    %57 = vector.broadcast %cst_22 : f32 to vector<1x32xf32>
    %58 = arith.mulf %56, %57 : vector<1x32xf32>
    %59 = arith.index_cast %c3_i32 : i32 to index
    %c0_23 = arith.constant 0 : index
    %60 = vector.load %arg3[%59, %c0_23] : memref<8x32xf32, #tpu.memory_space<vmem>>, vector<1x32xf32>
    %61 = arith.addf %58, %60 : vector<1x32xf32>
    %62 = arith.fptosi %61 : vector<1x32xf32> to vector<1x32xi32>
    %63 = arith.index_cast %c3_i32 : i32 to index
    %c0_24 = arith.constant 0 : index
    %64 = vector.load %arg4[%63, %c0_24] : memref<8x32xi32, #tpu.memory_space<vmem>>, vector<1x32xi32>
    tpu.vector_store %arg4[%63, %c0_24], %62 {strides = array<i32>} : memref<8x32xi32, #tpu.memory_space<vmem>>, vector<1x32xi32>,
    %c4_i32 = arith.constant 4 : i32
    %65 = arith.addi %0, %c4_i32 : i32
    %c7_i32_25 = arith.constant 7 : i32
    %66 = arith.minsi %65, %c7_i32_25 : i32
    %67 = arith.index_cast %66 : i32 to index
    %68 = memref.load %arg1[%67] : memref<8xi32, #tpu.memory_space<smem>>
    %c0_i32_26 = arith.constant 0 : i32
    %c7_i32_27 = arith.constant 7 : i32
    %69 = arith.maxsi %c0_i32_26, %68 : i32
    %70 = arith.minsi %c7_i32_27, %69 : i32
    %71 = arith.index_cast %70 : i32 to index
    %c0_28 = arith.constant 0 : index
    %72 = vector.load %arg2[%71, %c0_28] : memref<8x32xf32, #tpu.memory_space<vmem>>, vector<1x32xf32>
    %cst_29 = arith.constant 5.65685415 : f32
    %73 = vector.broadcast %cst_29 : f32 to vector<1x32xf32>
    %74 = arith.mulf %72, %73 : vector<1x32xf32>
    %75 = arith.index_cast %c4_i32 : i32 to index
    %c0_30 = arith.constant 0 : index
    %76 = vector.load %arg3[%75, %c0_30] : memref<8x32xf32, #tpu.memory_space<vmem>>, vector<1x32xf32>
    %77 = arith.addf %74, %76 : vector<1x32xf32>
    %78 = arith.fptosi %77 : vector<1x32xf32> to vector<1x32xi32>
    %79 = arith.index_cast %c4_i32 : i32 to index
    %c0_31 = arith.constant 0 : index
    %80 = vector.load %arg4[%79, %c0_31] : memref<8x32xi32, #tpu.memory_space<vmem>>, vector<1x32xi32>
    tpu.vector_store %arg4[%79, %c0_31], %78 {strides = array<i32>} : memref<8x32xi32, #tpu.memory_space<vmem>>, vector<1x32xi32>,
    %c5_i32 = arith.constant 5 : i32
    %81 = arith.addi %0, %c5_i32 : i32
    %c7_i32_32 = arith.constant 7 : i32
    %82 = arith.minsi %81, %c7_i32_32 : i32
    %83 = arith.index_cast %82 : i32 to index
    %84 = memref.load %arg1[%83] : memref<8xi32, #tpu.memory_space<smem>>
    %c0_i32_33 = arith.constant 0 : i32
    %c7_i32_34 = arith.constant 7 : i32
    %85 = arith.maxsi %c0_i32_33, %84 : i32
    %86 = arith.minsi %c7_i32_34, %85 : i32
    %87 = arith.index_cast %86 : i32 to index
    %c0_35 = arith.constant 0 : index
    %88 = vector.load %arg2[%87, %c0_35] : memref<8x32xf32, #tpu.memory_space<vmem>>, vector<1x32xf32>
    %cst_36 = arith.constant 5.65685415 : f32
    %89 = vector.broadcast %cst_36 : f32 to vector<1x32xf32>
    %90 = arith.mulf %88, %89 : vector<1x32xf32>
    %91 = arith.index_cast %c5_i32 : i32 to index
    %c0_37 = arith.constant 0 : index
    %92 = vector.load %arg3[%91, %c0_37] : memref<8x32xf32, #tpu.memory_space<vmem>>, vector<1x32xf32>
    %93 = arith.addf %90, %92 : vector<1x32xf32>
    %94 = arith.fptosi %93 : vector<1x32xf32> to vector<1x32xi32>
    %95 = arith.index_cast %c5_i32 : i32 to index
    %c0_38 = arith.constant 0 : index
    %96 = vector.load %arg4[%95, %c0_38] : memref<8x32xi32, #tpu.memory_space<vmem>>, vector<1x32xi32>
    tpu.vector_store %arg4[%95, %c0_38], %94 {strides = array<i32>} : memref<8x32xi32, #tpu.memory_space<vmem>>, vector<1x32xi32>,
    %c6_i32 = arith.constant 6 : i32
    %97 = arith.addi %0, %c6_i32 : i32
    %c7_i32_39 = arith.constant 7 : i32
    %98 = arith.minsi %97, %c7_i32_39 : i32
    %99 = arith.index_cast %98 : i32 to index
    %100 = memref.load %arg1[%99] : memref<8xi32, #tpu.memory_space<smem>>
    %c0_i32_40 = arith.constant 0 : i32
    %c7_i32_41 = arith.constant 7 : i32
    %101 = arith.maxsi %c0_i32_40, %100 : i32
    %102 = arith.minsi %c7_i32_41, %101 : i32
    %103 = arith.index_cast %102 : i32 to index
    %c0_42 = arith.constant 0 : index
    %104 = vector.load %arg2[%103, %c0_42] : memref<8x32xf32, #tpu.memory_space<vmem>>, vector<1x32xf32>
    %cst_43 = arith.constant 5.65685415 : f32
    %105 = vector.broadcast %cst_43 : f32 to vector<1x32xf32>
    %106 = arith.mulf %104, %105 : vector<1x32xf32>
    %107 = arith.index_cast %c6_i32 : i32 to index
    %c0_44 = arith.constant 0 : index
    %108 = vector.load %arg3[%107, %c0_44] : memref<8x32xf32, #tpu.memory_space<vmem>>, vector<1x32xf32>
    %109 = arith.addf %106, %108 : vector<1x32xf32>
    %110 = arith.fptosi %109 : vector<1x32xf32> to vector<1x32xi32>
    %111 = arith.index_cast %c6_i32 : i32 to index
    %c0_45 = arith.constant 0 : index
    %112 = vector.load %arg4[%111, %c0_45] : memref<8x32xi32, #tpu.memory_space<vmem>>, vector<1x32xi32>
    tpu.vector_store %arg4[%111, %c0_45], %110 {strides = array<i32>} : memref<8x32xi32, #tpu.memory_space<vmem>>, vector<1x32xi32>,
    %c7_i32_46 = arith.constant 7 : i32
    %113 = arith.addi %0, %c7_i32_46 : i32
    %c7_i32_47 = arith.constant 7 : i32
    %114 = arith.minsi %113, %c7_i32_47 : i32
    %115 = arith.index_cast %114 : i32 to index
    %116 = memref.load %arg1[%115] : memref<8xi32, #tpu.memory_space<smem>>
    %c0_i32_48 = arith.constant 0 : i32
    %c7_i32_49 = arith.constant 7 : i32
    %117 = arith.maxsi %c0_i32_48, %116 : i32
    %118 = arith.minsi %c7_i32_49, %117 : i32
    %119 = arith.index_cast %118 : i32 to index
    %c0_50 = arith.constant 0 : index
    %120 = vector.load %arg2[%119, %c0_50] : memref<8x32xf32, #tpu.memory_space<vmem>>, vector<1x32xf32>
    %cst_51 = arith.constant 5.65685415 : f32
    %121 = vector.broadcast %cst_51 : f32 to vector<1x32xf32>
    %122 = arith.mulf %120, %121 : vector<1x32xf32>
    %123 = arith.index_cast %c7_i32_46 : i32 to index
    %c0_52 = arith.constant 0 : index
    %124 = vector.load %arg3[%123, %c0_52] : memref<8x32xf32, #tpu.memory_space<vmem>>, vector<1x32xf32>
    %125 = arith.addf %122, %124 : vector<1x32xf32>
    %126 = arith.fptosi %125 : vector<1x32xf32> to vector<1x32xi32>
    %127 = arith.index_cast %c7_i32_46 : i32 to index
    %c0_53 = arith.constant 0 : index
    %128 = vector.load %arg4[%127, %c0_53] : memref<8x32xi32, #tpu.memory_space<vmem>>, vector<1x32xi32>
    tpu.vector_store %arg4[%127, %c0_53], %126 {strides = array<i32>} : memref<8x32xi32, #tpu.memory_space<vmem>>, vector<1x32xi32>,
    %c8_i32_54 = arith.constant 8 : i32
    return
  }
  func.func @transform_0(%arg0: i32, %arg1: memref<8xi32, #tpu.memory_space<smem>>) -> (i32, i32) {
    %c0_i32 = arith.constant 0 : i32
    %c0_i32_0 = arith.constant 0 : i32
    %c0_i32_1 = arith.constant 0 : i32
    return %c0_i32, %c0_i32_0 : i32, i32
  }
  func.func @transform_1(%arg0: i32, %arg1: memref<8xi32, #tpu.memory_space<smem>>) -> (i32, i32) {
    %c0_i32 = arith.constant 0 : i32
    %c0_i32_0 = arith.constant 0 : i32
    return %arg0, %c0_i32 : i32, i32
  }
  func.func @transform_2(%arg0: i32, %arg1: memref<8xi32, #tpu.memory_space<smem>>) -> (i32, i32) {
    %c0_i32 = arith.constant 0 : i32
    %c0_i32_0 = arith.constant 0 : i32
    return %arg0, %c0_i32 : i32, i32
  }
}

</mosaic_0001>

<bundles_post_ra>
// kernel: tpu_custom_call.1
= control target key start
LH: loop header
LB: loop body
LE: loop exit
PB: predicated region body
PF: predicated region fallthrough
CT: control target
= control target key end

     0   :  { %s458_s0 = inlined_call_operand.hbm [shape: s32[8], index: 0, kind: input, shape index: {}]   ;;  %s459_s1 = inlined_call_operand.hbm [shape: f32[8,32], index: 1, kind: input, shape index: {}]   ;;  %s460_s2 = inlined_call_operand.hbm [shape: f32[8,32], index: 2, kind: input, shape index: {}]   ;;  %s461_s3 = inlined_call_operand.hbm [shape: s32[8,32], index: 3, kind: output, shape index: {}]  }
   0x1   :  { %s269_s14 = scalar_lea.hbm %s458_s0, 16 }
   0x2   :  { %p270_p0 = scmp.ne.s32.totalorder %s458_s0, %s269_s14  ;;  %p273_p1 = scmp.lt.u32.totalorder %s269_s14, %s458_s0 }
   0x4   :  { %p275_p2 = pnand %p273_p1, %p270_p0 }
   0x6   :  { %278 = shalt.err (!%p275_p2)  }
   0x7   :  { %s353_s19 = smov [#allocation3]  }
   0x8   :  { %9 = dma.hbm_to_smem %s458_s0, 16, %s353_s19, [#allocation2] }
   0x9   :  { %345 = dma.done.wait [#allocation2], 16 }
   0xa   :  { %346 = vsyncadd [#allocation2], 4294967280 }
   0xb   :  { %11 = sfence }
   0xc   :  { %12 = vsyncpa [#allocation5], 0 }
   0xd   :  { %13 = vsyncpa [#allocation8], 0 }
   0xe   :  { %14 = vsyncpa [#allocation6], 0  ;;  %s354_s22 = smov [#allocation4]   ;;  %s355_s24 = smov [#allocation7]  }
   0xf   :  { %s21_s23 = sshll.u32 %s354_s22, 4  ;;  %s31_s25 = sshll.u32 %s355_s24, 4  ;;  %s22_s23 = int_to_ptr.vmem [resolvable:$true] %s21_s23  ;;  %s32_s25 = int_to_ptr.vmem [resolvable:$true] %s31_s25 }
  0x10   :  { %s279_s28 = scalar_lea.hbm %s459_s1, 128 }
  0x11   :  { %p280_p3 = scmp.ne.s32.totalorder %s459_s1, %s279_s28  ;;  %p283_p4 = scmp.lt.u32.totalorder %s279_s28, %s459_s1 }
  0x13   :  { %p285_p5 = pnand %p283_p4, %p280_p3 }
  0x15   :  { %288 = shalt.err (!%p285_p5)
}
  0x16   :  { %s289_s5 = scalar_lea.vmem %s22_s23, 128  ;;  %p294_p7 = scmp.lt.s32.totalorder %s22_s23, %s22_s23 }
  0x17   :  { %p290_p6 = scmp.ne.s32.totalorder %s22_s23, %s289_s5  ;;  %p295_p8 = scmp.lt.s32.totalorder %s289_s5, %s289_s5 }
  0x19   :  { %p296_p9 = por %p295_p8, %p294_p7 }
  0x1b   :  { %p297_p10 = pnand %p296_p9, %p290_p6 }
  0x1d   :  { %300 = shalt.err (!%p297_p10)
}
  0x1e   :  { %24 = dma.hbm_to_vmem [thread:$0]  %s459_s1, 128, %s22_s23, [#allocation5]  }
  0x1f   :  { %s301_s10 = scalar_lea.hbm %s460_s2, 128 }
  0x20   :  { %p302_p11 = scmp.ne.s32.totalorder %s460_s2, %s301_s10  ;;  %p305_p12 = scmp.lt.u32.totalorder %s301_s10, %s460_s2 }
  0x22   :  { %p307_p13 = pnand %p305_p12, %p302_p11 }
  0x24   :  { %310 = shalt.err (!%p307_p13)
}
  0x25   :  { %s311_s15 = scalar_lea.vmem %s32_s25, 128  ;;  %p316_p1 = scmp.lt.s32.totalorder %s32_s25, %s32_s25 }
  0x26   :  { %p312_p0 = scmp.ne.s32.totalorder %s32_s25, %s311_s15  ;;  %p317_p2 = scmp.lt.s32.totalorder %s311_s15, %s311_s15 }
  0x28   :  { %p318_p3 = por %p317_p2, %p316_p1 }
  0x2a   :  { %p319_p4 = pnand %p318_p3, %p312_p0 }
  0x2c   :  { %322 = shalt.err (!%p319_p4)
}
  0x2d   :  { %34 = dma.hbm_to_vmem [thread:$0]  %s460_s2, 128, %s32_s25, [#allocation8]  }
  0x2e   :  { %347 = dma.done.wait [#allocation5], 128  }
  0x2f   :  { %348 = vsyncadd [#allocation5], 4294967168 }
  0x30   :  { %349 = dma.done.wait [#allocation8], 128  }
  0x31   :  { %350 = vsyncadd [#allocation8], 4294967168  ;;  %s44_s17 = sld [smem:[#allocation3]]  ;;  %s191_s18 = sld [smem:[#allocation3 + $0x1]]  ;;  %v52_v0 = vld [vmem:[#allocation7] sm:$0x1] }
  0x32   :  { %s197_s19 = sld [smem:[#allocation3 + $0x2]]  ;;  %s413_s20 = sld [smem:[#allocation3 + $0x3]]  ;;  %v68_v2 = vld [vmem:[#allocation7 + $0x1] sm:$0x1]  ;;  %vm55_vm0 = vcmask 253952  }
  0x33   :  { %s415_s21 = sld [smem:[#allocation3 + $0x4]]  ;;  %s417_s22 = sld [smem:[#allocation3 + $0x5]]  ;;  %v83_v11 = vld [vmem:[#allocation7 + $0x2] sm:$0x1]  ;;  %v98_v17 = vld [vmem:[#allocation7 + $0x3] sm:$0x1] }
  0x34   :  { %s419_s23 = sld [smem:[#allocation3 + $0x6]]  ;;  %s421_s24 = sld [smem:[#allocation3 + $0x7]]  ;;  %v113_v23 = vld [vmem:[#allocation7 + $0x4] sm:$0x1]  ;;  %v128_v29 = vld [vmem:[#allocation7 + $0x5] sm:$0x1] }
  0x35   :  { %v143_v35 = vld [vmem:[#allocation7 + $0x6] sm:$0x1]  ;;  %v158_v41 = vld [vmem:[#allocation7 + $0x7] sm:$0x1]  ;;  %s356_s6 = smov [#allocation9]  }
  0x36   :  { %s168_s7 = sshll.u32 %s356_s6, 4  ;;  %s169_s7 = int_to_ptr.vmem [resolvable:$true] %s168_s7 }
  0x37   :  { %p45_p5 = scmp.gt.s32.totalorder %s44_s17, 0  ;;  %p186_p6 = scmp.lt.s32.totalorder %s44_s17, 7 }
  0x38   :  { %p61_p7 = scmp.gt.s32.totalorder %s191_s18, 0  ;;  %p192_p8 = scmp.lt.s32.totalorder %s191_s18, 7 }
  0x39   :  { %s463_s17 = smov (!%p45_p5, %s44_s17), 0  ;;  %p76_p9 = scmp.gt.s32.totalorder %s197_s19, 0 }
  0x3a   :  { %s465_s18 = smov (!%p61_p7, %s191_s18), 0  ;;  %s467_s17 = smov (!%p186_p6, %s463_s17), 7 }
  0x3b   :  { %s469_s18 = smov (!%p192_p8, %s465_s18), 7  ;;  %s49_s2 = scalar_lea.vmem [#allocation4], %s467_s17 }
  0x3c   :  { %v50_v1 = vld [vmem:[%s49_s2] sm:$0x1]  ;;  %p198_p10 = scmp.lt.s32.totalorder %s197_s19, 7  ;;  %s65_s25 = scalar_lea.vmem [#allocation4], %s469_s18 }
  0x3d   :  { %v51_v3 = vmul.f32 5.656854, %v50_v1  ;;  %v66_v4 = vld [vmem:[%s65_s25] sm:$0x1]  ;;  %s471_s19 = smov (!%p76_p9, %s197_s19), 0  ;;  %p91_p11 = scmp.gt.s32.totalorder %s413_s20, 0 }
  0x3e   :  { %v67_v5 = vmul.f32 5.656854, %v66_v4  ;;  %p204_p12 = scmp.lt.s32.totalorder %s413_s20, 7  ;;  %s473_s19 = smov (!%p198_p10, %s471_s19), 7 }
  0x3f   :  { %v53_v6 = vadd.f32 %v52_v0, %v51_v3  ;;  %s475_s20 = smov (!%p91_p11, %s413_s20), 0  ;;  %p106_p13 = scmp.gt.s32.totalorder %s415_s21, 0 }
  0x40   :  { %v69_v7 = vadd.f32 %v68_v2, %v67_v5  ;;  %s80_s26 = scalar_lea.vmem [#allocation4], %s473_s19  ;;  %s477_s20 = smov (!%p204_p12, %s475_s20), 7 }
  0x41   :  { %v249_v8 = vtrunc.f32 %v53_v6  ;;  %v81_v10 = vld [vmem:[%s80_s26] sm:$0x1]  ;;  %s107_s27 = scalar_select %p106_p13, %s415_s21, 0 }
  0x42   :  { %v251_v9 = vtrunc.f32 %v69_v7  ;;  %v82_v13 = vmul.f32 5.656854, %v81_v10  ;;  %p210_p0 = scmp.lt.s32.totalorder %s415_s21, 7  ;;  %s95_s28 = scalar_lea.vmem [#allocation4], %s477_s20 }
  0x43   :  { %v250_v12 = vcvt.f32.s32 %v249_v8  ;;  %v96_v16 = vld [vmem:[%s95_s28] sm:$0x1]  ;;  %p121_p1 = scmp.gt.s32.totalorder %s417_s22, 0  ;;  %p216_p2 = scmp.lt.s32.totalorder %s417_s22, 7 }
  0x44   :  { %v252_v14 = vcvt.f32.s32 %v251_v9  ;;  %v84_v15 = vadd.f32 %v83_v11, %v82_v13  ;;  %v97_v18 = vmul.f32 5.656854, %v96_v16  ;;  %s479_s27 = smov (!%p210_p0, %s107_s27), 7  ;;  %p136_p3 = scmp.gt.s32.totalorder %s419_s23, 0 }
  0x45   :  { %56 = vst.msk [vmem:[#allocation9] sm:$0x1] %vm55_vm0, %v250_v12  ;;  %s481_s22 = smov (!%p121_p1, %s417_s22), 0  ;;  %s110_s29 = scalar_lea.vmem [#allocation4], %s479_s27 }
  0x46   :  { %71 = vst.msk [vmem:[#allocation9 + $0x1] sm:$0x1] %vm55_vm0, %v252_v14  ;;  %v253_v19 = vtrunc.f32 %v84_v15  ;;  %v99_v20 = vadd.f32 %v98_v17, %v97_v18  ;;  %v111_v22 = vld [vmem:[%s110_s29] sm:$0x1]  ;;  %s483_s22 = smov (!%p216_p2, %s481_s22), 7  ;;  %p222_p4 = scmp.lt.s32.totalorder %s419_s23, 7 }
  0x47   :  { %v112_v25 = vmul.f32 5.656854, %v111_v22  ;;  %s137_s30 = scalar_select %p136_p3, %s419_s23, 0 }
  0x48   :  { %v254_v21 = vcvt.f32.s32 %v253_v19  ;;  %v255_v24 = vtrunc.f32 %v99_v20  ;;  %s125_s0 = scalar_lea.vmem [#allocation4], %s483_s22  ;;  %p151_p5 = scmp.gt.s32.totalorder %s421_s24, 0 }
  0x49   :  { %v114_v27 = vadd.f32 %v113_v23, %v112_v25  ;;  %v126_v28 = vld [vmem:[%s125_s0] sm:$0x1]  ;;  %p228_p6 = scmp.lt.s32.totalorder %s421_s24, 7  ;;  %s485_s30 = smov (!%p222_p4, %s137_s30), 7 }
  0x4a   :  { %86 = vst.msk [vmem:[#allocation9 + $0x2] sm:$0x1] %vm55_vm0, %v254_v21  ;;  %v256_v26 = vcvt.f32.s32 %v255_v24  ;;  %v127_v30 = vmul.f32 5.656854, %v126_v28  ;;  %s487_s24 = smov (!%p151_p5, %s421_s24), 0  ;;  %s140_s4 = scalar_lea.vmem [#allocation4], %s485_s30 }
  0x4b   :  { %v257_v31 = vtrunc.f32 %v114_v27  ;;  %v141_v34 = vld [vmem:[%s140_s4] sm:$0x1]  ;;  %s489_s24 = smov (!%p228_p6, %s487_s24), 7  ;;  %s323_s8 = scalar_lea.vmem %s169_s7, 128 }
  0x4c   :  { %101 = vst.msk [vmem:[#allocation9 + $0x3] sm:$0x1] %vm55_vm0, %v256_v26  ;;  %v129_v32 = vadd.f32 %v128_v29, %v127_v30  ;;  %v142_v37 = vmul.f32 5.656854, %v141_v34  ;;  %s155_s5 = scalar_lea.vmem [#allocation4], %s489_s24  ;;  %p324_p7 = scmp.ne.s32.totalorder %s169_s7, %s323_s8 }
  0x4d   :  { %v258_v33 = vcvt.f32.s32 %v257_v31  ;;  %v156_v40 = vld [vmem:[%s155_s5] sm:$0x1]  ;;  %p328_p8 = scmp.lt.s32.totalorder %s169_s7, %s169_s7  ;;  %p329_p9 = scmp.lt.s32.totalorder %s323_s8, %s323_s8 }
  0x4e   :  { %v259_v36 = vtrunc.f32 %v129_v32  ;;  %v144_v39 = vadd.f32 %v143_v35, %v142_v37  ;;  %v157_v42 = vmul.f32 5.656854, %v156_v40 }
  0x4f   :  { %116 = vst.msk [vmem:[#allocation9 + $0x4] sm:$0x1] %vm55_vm0, %v258_v33  ;;  %p330_p10 = por %p329_p9, %p328_p8 }
  0x50   :  { %v260_v38 = vcvt.f32.s32 %v259_v36  ;;  %v261_v43 = vtrunc.f32 %v144_v39  ;;  %v159_v44 = vadd.f32 %v158_v41, %v157_v42 }
  0x51   :  { %p331_p11 = pnand %p330_p10, %p324_p7 }
  0x52   :  { %131 = vst.msk [vmem:[#allocation9 + $0x5] sm:$0x1] %vm55_vm0, %v260_v38  ;;  %v262_v45 = vcvt.f32.s32 %v261_v43  ;;  %v263_v46 = vtrunc.f32 %v159_v44 }
  0x54   :  { %146 = vst.msk [vmem:[#allocation9 + $0x6] sm:$0x1] %vm55_vm0, %v262_v45  ;;  %v264_v47 = vcvt.f32.s32 %v263_v46 }
  0x56   :  { %161 = vst.msk [vmem:[#allocation9 + $0x7] sm:$0x1] %vm55_vm0, %v264_v47 }
  0x57   :  { %334 = shalt.err (!%p331_p11)
}
  0x58   :  { %s335_s11 = scalar_lea.hbm %s461_s3, 128 }
  0x59   :  { %p336_p12 = scmp.ne.s32.totalorder %s461_s3, %s335_s11  ;;  %p339_p13 = scmp.lt.u32.totalorder %s335_s11, %s461_s3 }
  0x5b   :  { %p341_p0 = pnand %p339_p13, %p336_p12 }
  0x5d   :  { %344 = shalt.err (!%p341_p0)
}
  0x5e   :  { %171 = dma.vmem_to_hbm [thread:$0]  %s169_s7, 128, %s461_s3, [#allocation6]  }
  0x5f   :  { %351 = dma.done.wait [#allocation6], 128  }
  0x60   :  { %352 = vsyncadd [#allocation6], 4294967168 }
  0x61   :  { %175 = vsyncpa [#allocation5], 1 }
  0x62   :  { %176 = vsyncpa [#allocation8], 1 }
  0x63   :  { %177 = vsyncpa [#allocation6], 1 }

</bundles_post_ra>
